<compile_context>
chip_gen: v7x
topology: tpu7x:2x2x1
jax: 0.10.0
libtpu: 0.0.40
codegen_flags: <defaults>
</compile_context>

<pallas_src>
import jax
import jax.numpy as jnp
from jax.experimental import pallas as pl
from jax.experimental.pallas import tpu as pltpu


def _round_up(x, m):
    return ((x + m - 1) // m) * m


def teacher_test_kernel(x_ref, wf_ref, wt_ref, o_ref, acc_ref):
    """One (batch-tile i, feature-chunk k) grid step.

    x_ref  : [tm, tk]  f32   flattened-image chunk (cast to bf16 in-kernel)
    wf_ref : [tk, D]   bf16  featurizer projection chunk (encode_image stand-in)
    wt_ref : [D, Kp]   bf16  pre-transposed, pre-scaled (100x) normalized text features
    o_ref  : [tm, Kp]  f32   logits tile (lane-dense, K padded to 128)
    acc_ref: [tm, D]   f32   feature accumulator, resident across the F reduction
    """
    k = pl.program_id(1)

    @pl.when(k == 0)
    def _():
        acc_ref[...] = jnp.zeros_like(acc_ref)

    # In-kernel bf16 cast (avoids a padded bf16 copy of the largest tensor in HBM),
    # then partial [tm, tk] @ [tk, D] on the MXU with f32 accumulation.
    x_bf = x_ref[...].astype(jnp.bfloat16)
    acc_ref[...] += jnp.dot(x_bf, wf_ref[...],
                            preferred_element_type=jnp.float32)

    @pl.when(k == pl.num_programs(1) - 1)
    def _():
        feats = acc_ref[...]                                     # [tm, D] f32
        # L2 normalize (image_features / image_features.norm(dim=-1)).
        # Tiny guard keeps padded all-zero rows finite; real rows unaffected.
        sq = jnp.sum(feats * feats, axis=-1, keepdims=True)
        feats = feats * jax.lax.rsqrt(jnp.maximum(sq, 1e-30))
        # logits = feats @ (100 * text_features)^T ; bf16 operands, f32 accumulate.
        o_ref[...] = jnp.dot(feats.astype(jnp.bfloat16), wt_ref[...],
                             preferred_element_type=jnp.float32)


def teacher_test_forward(images, w_feat, w_text, bias, *, tm=512, tk=1024):
    """images: [B, C, H, W] f32 (NCHW). Returns logits [B, K] f32."""
    B = images.shape[0]
    F = 1
    for d in images.shape[1:]:
        F *= int(d)
    D = w_feat.shape[1]
    K = w_text.shape[0]

    # ---- tile selection -----------------------------------------------------
    tm = min(tm, _round_up(B, 8))            # f32 sublane-aligned batch tile
    if B >= 16 and tm <= B < 2 * tm:
        # Split the batch into two tiles so both v7x TensorCores get work.
        tm = _round_up((B + 1) // 2, 8)
    tk = min(tk, _round_up(F, 128))          # lane-aligned reduction tile

    Bp = _round_up(B, tm)
    Fp = _round_up(F, tk)
    Kp = _round_up(K, 128)                   # lane-dense logits (unmasked stores)

    # ---- plain-JAX glue: flatten; pad ONLY when tiles don't divide ----------
    x = images.reshape(B, F)                 # stays f32; cast happens in-kernel
    if (Bp, Fp) != (B, F):
        x = jnp.zeros((Bp, Fp), x.dtype).at[:B, :F].set(x)

    wf = w_feat.astype(jnp.bfloat16)
    if Fp != F:
        wf = jnp.zeros((Fp, D), jnp.bfloat16).at[:F, :].set(wf)

    # Pre-transpose + fold the 100x logit scale into the (small) text matrix; bf16.
    wt = jnp.zeros((D, Kp), jnp.bfloat16).at[:, :K].set(
        (100.0 * w_text.astype(jnp.float32)).T.astype(jnp.bfloat16))

    grid = (Bp // tm, Fp // tk)
    n_btiles = Bp // tm

    # ---- VMEM budget (double-buffered streams + resident accumulator) -------
    vmem_bytes = (2 * tm * tk * 4            # x tiles (f32)
                  + 2 * tk * D * 2           # wf tiles (bf16)
                  + tm * D * 4               # accumulator
                  + 2 * tm * Kp * 4          # output tiles (f32)
                  + 2 * D * Kp * 2)          # wt (worst case double-buffered, bf16)
    vmem_limit = min(48 << 20, max(32 << 20, 2 * vmem_bytes))

    cost = pl.CostEstimate(
        flops=2 * Bp * Fp * D + 2 * Bp * D * Kp,
        transcendentals=Bp,                  # one rsqrt per row
        bytes_accessed=(Bp * Fp * 4          # x read once (f32)
                        + n_btiles * Fp * D * 2  # wf re-read once per batch tile
                        + D * Kp * 2         # text matrix
                        + Bp * Kp * 4),      # logits written
    )

    def _run(single_buffer_wt):
        if single_buffer_wt:
            # Constant-index block: single-buffer it to save D*Kp*2 bytes of VMEM.
            wt_spec = pl.BlockSpec((D, Kp), lambda i, k: (0, 0),
                                   pipeline_mode=pl.Buffered(1))
        else:
            wt_spec = pl.BlockSpec((D, Kp), lambda i, k: (0, 0))
        return pl.pallas_call(
            teacher_test_kernel,
            out_shape=jax.ShapeDtypeStruct((Bp, Kp), jnp.float32),
            grid_spec=pltpu.PrefetchScalarGridSpec(
                num_scalar_prefetch=0,
                grid=grid,
                in_specs=[
                    pl.BlockSpec((tm, tk), lambda i, k: (i, k)),  # x chunk (streamed)
                    pl.BlockSpec((tk, D), lambda i, k: (k, 0)),   # featurizer chunk
                    wt_spec,                                      # text features (resident)
                ],
                out_specs=pl.BlockSpec((tm, Kp), lambda i, k: (i, 0)),
                scratch_shapes=[pltpu.VMEM((tm, D), jnp.float32)],
            ),
            compiler_params=pltpu.CompilerParams(
                dimension_semantics=("parallel", "arbitrary"),
                vmem_limit_bytes=vmem_limit),
            cost_estimate=cost,
        )(x, wf, wt)

    try:
        logits_p = _run(True)
    except Exception:
        # pipeline_mode=pl.Buffered(1) unsupported on this jax version; fall back
        # to the default (double-buffered) spec for the constant wt block.
        logits_p = _run(False)

    # Slice off padding; re-apply the (zero-initialized) linear bias for generality:
    # 100 * (feats @ W^T + b) = (feats @ 100*W^T) + 100*b.
    return logits_p[:B, :K] + 100.0 * bias.astype(jnp.float32)[None, :]


if __name__ == "__main__":
    # Small, deterministic shapes consistent with the module's forward.
    B, C, H, W = 8, 3, 16, 16          # images (NCHW)
    D = 128                            # feature_dim (CLIP embedding dim, small here)
    K = 8                              # number of text prompts / classes
    F = C * H * W

    key = jax.random.PRNGKey(0)
    k_img, k_wf, k_wt = jax.random.split(key, 3)

    images = jax.random.normal(k_img, (B, C, H, W), dtype=jnp.float32)

    # Synthetic featurizer projection (stand-in for CLIP encode_image).
    w_feat = jax.random.normal(k_wf, (F, D), dtype=jnp.float32) * 0.02

    # Synthetic text features: L2-normalized rows (encode_text + norm in __init__).
    w_text = jax.random.normal(k_wt, (K, D), dtype=jnp.float32)
    w_text = w_text / jnp.linalg.norm(w_text, axis=-1, keepdims=True)

    # nn.init.zeros_(self.linear.bias)
    bias = jnp.zeros((K,), dtype=jnp.float32)

    logits = teacher_test_forward(images, w_feat, w_text, bias)
    logits = jax.block_until_ready(logits)

    # Reference in plain JAX, emulating the kernel's precision choices
    # (bf16 matmul operands, f32 accumulation; normalize in f32).
    x_bf = images.reshape(B, F).astype(jnp.bfloat16).astype(jnp.float32)
    wf_bf = w_feat.astype(jnp.bfloat16).astype(jnp.float32)
    feats_ref = x_bf @ wf_bf
    feats_ref = feats_ref / jnp.linalg.norm(feats_ref, axis=-1, keepdims=True)
    feats_bf = feats_ref.astype(jnp.bfloat16).astype(jnp.float32)
    wt_bf = (100.0 * w_text.T).astype(jnp.bfloat16).astype(jnp.float32)
    ref = feats_bf @ wt_bf + 100.0 * bias[None, :]

    assert logits.shape == (B, K)
    assert jnp.allclose(logits, ref, atol=2e-2, rtol=2e-2), float(
        jnp.max(jnp.abs(logits - ref)))

    print("KERNEL_OK")
</pallas_src>

<mosaic_0001>
module attributes {stable_mosaic.version = 11 : i64} {
  func.func @teacher_test_kernel(%arg0: i32, %arg1: i32, %arg2: memref<8x768xf32, #tpu.memory_space<vmem>>, %arg3: memref<768x128xbf16, #tpu.memory_space<vmem>>, %arg4: memref<128x128xbf16, #tpu.memory_space<vmem>>, %arg5: memref<8x128xf32, #tpu.memory_space<vmem>>, %arg6: memref<8x128xf32, #tpu.memory_space<vmem>>) attributes {dimension_semantics = [#tpu.dimension_semantics<parallel>, #tpu.dimension_semantics<arbitrary>], iteration_bounds = array<i64: 1, 1>, scalar_prefetch = 0 : i64, scratch_operands = 1 : i64, tpu.core_type = #tpu.core_type<tc>, window_params = [{transform_indices = @transform_0, window_bounds = array<i64: 8, 768>}, {transform_indices = @transform_1, window_bounds = array<i64: 768, 128>}, {pipeline_mode = #tpu.pipeline_mode<synchronous>, transform_indices = @transform_2, window_bounds = array<i64: 128, 128>}, {transform_indices = @transform_3, window_bounds = array<i64: 8, 128>}]} {
    %c0_i32 = arith.constant 0 : i32
    %0 = arith.cmpi eq, %arg1, %c0_i32 : i32
    %1 = arith.extui %0 : i1 to i32
    %c0_i32_0 = arith.constant 0 : i32
    %2 = arith.cmpi ne, %1, %c0_i32_0 : i32
    scf.if %2 {
      %cst_10 = arith.constant 0.000000e+00 : f32
      %13 = vector.broadcast %cst_10 : f32 to vector<8x128xf32>
      %c0_11 = arith.constant 0 : index
      %c0_12 = arith.constant 0 : index
      %14 = vector.load %arg6[%c0_11, %c0_12] : memref<8x128xf32, #tpu.memory_space<vmem>>, vector<8x128xf32>
      tpu.vector_store %arg6[%c0_11, %c0_12], %13 {strides = array<i32>} : memref<8x128xf32, #tpu.memory_space<vmem>>, vector<8x128xf32>,
    } else {
    }
    %c0 = arith.constant 0 : index
    %c0_1 = arith.constant 0 : index
    %3 = vector.load %arg2[%c0, %c0_1] : memref<8x768xf32, #tpu.memory_space<vmem>>, vector<8x768xf32>
    %4 = arith.truncf %3 : vector<8x768xf32> to vector<8x768xbf16>
    %c0_2 = arith.constant 0 : index
    %c0_3 = arith.constant 0 : index
    %5 = vector.load %arg6[%c0_2, %c0_3] : memref<8x128xf32, #tpu.memory_space<vmem>>, vector<8x128xf32>
    %c0_4 = arith.constant 0 : index
    %c0_5 = arith.constant 0 : index
    %6 = vector.load %arg3[%c0_4, %c0_5] : memref<768x128xbf16, #tpu.memory_space<vmem>>, vector<768x128xbf16>
    %cst = arith.constant dense<0.000000e+00> : vector<8x128xf32>
    %7 = tpu.matmul %4, %6, %cst {dimension_numbers = #tpu.dot_dimension_numbers<[1], [0], [0], [1], [0, 0, 1, 1], [], []>} : vector<8x768xbf16>, vector<768x128xbf16>, vector<8x128xf32> -> vector<8x128xf32>
    %8 = arith.addf %5, %7 : vector<8x128xf32>
    %c0_6 = arith.constant 0 : index
    %c0_7 = arith.constant 0 : index
    %9 = vector.load %arg6[%c0_6, %c0_7] : memref<8x128xf32, #tpu.memory_space<vmem>>, vector<8x128xf32>
    tpu.vector_store %arg6[%c0_6, %c0_7], %8 {strides = array<i32>} : memref<8x128xf32, #tpu.memory_space<vmem>>, vector<8x128xf32>,
    %c0_i32_8 = arith.constant 0 : i32
    %10 = arith.cmpi eq, %arg1, %c0_i32_8 : i32
    %11 = arith.extui %10 : i1 to i32
    %c0_i32_9 = arith.constant 0 : i32
    %12 = arith.cmpi ne, %11, %c0_i32_9 : i32
    scf.if %12 {
      %c0_10 = arith.constant 0 : index
      %c0_11 = arith.constant 0 : index
      %13 = vector.load %arg6[%c0_10, %c0_11] : memref<8x128xf32, #tpu.memory_space<vmem>>, vector<8x128xf32>
      %14 = arith.mulf %13, %13 : vector<8x128xf32>
      %cst_12 = arith.constant dense<0.000000e+00> : vector<8xf32>
      %15 = vector.multi_reduction <add>, %14, %cst_12 [1] : vector<8x128xf32> to vector<8xf32>
      %16 = vector.shape_cast %15 : vector<8xf32> to vector<8x1xf32>
      %cst_13 = arith.constant 1.000000e-30 : f32
      %17 = vector.broadcast %cst_13 : f32 to vector<8x1xf32>
      %18 = arith.maximumf %16, %17 : vector<8x1xf32>
      %19 = math.rsqrt %18 : vector<8x1xf32>
      %20 = vector.broadcast %19 : vector<8x1xf32> to vector<8x128xf32>
      %21 = arith.mulf %13, %20 : vector<8x128xf32>
      %22 = arith.truncf %21 : vector<8x128xf32> to vector<8x128xbf16>
      %c0_14 = arith.constant 0 : index
      %c0_15 = arith.constant 0 : index
      %23 = vector.load %arg4[%c0_14, %c0_15] : memref<128x128xbf16, #tpu.memory_space<vmem>>, vector<128x128xbf16>
      %cst_16 = arith.constant dense<0.000000e+00> : vector<8x128xf32>
      %24 = tpu.matmul %22, %23, %cst_16 {dimension_numbers = #tpu.dot_dimension_numbers<[1], [0], [0], [1], [0, 0, 1, 1], [], []>} : vector<8x128xbf16>, vector<128x128xbf16>, vector<8x128xf32> -> vector<8x128xf32>
      %c0_17 = arith.constant 0 : index
      %c0_18 = arith.constant 0 : index
      %25 = vector.load %arg5[%c0_17, %c0_18] : memref<8x128xf32, #tpu.memory_space<vmem>>, vector<8x128xf32>
      tpu.vector_store %arg5[%c0_17, %c0_18], %24 {strides = array<i32>} : memref<8x128xf32, #tpu.memory_space<vmem>>, vector<8x128xf32>,
    } else {
    }
    return
  }
  func.func @transform_0(%arg0: i32, %arg1: i32) -> (i32, i32) {
    %c0_i32 = arith.constant 0 : i32
    return %arg0, %arg1 : i32, i32
  }
  func.func @transform_1(%arg0: i32, %arg1: i32) -> (i32, i32) {
    %c0_i32 = arith.constant 0 : i32
    %c0_i32_0 = arith.constant 0 : i32
    return %arg1, %c0_i32 : i32, i32
  }
  func.func @transform_2(%arg0: i32, %arg1: i32) -> (i32, i32) {
    %c0_i32 = arith.constant 0 : i32
    %c0_i32_0 = arith.constant 0 : i32
    %c0_i32_1 = arith.constant 0 : i32
    return %c0_i32, %c0_i32_0 : i32, i32
  }
  func.func @transform_3(%arg0: i32, %arg1: i32) -> (i32, i32) {
    %c0_i32 = arith.constant 0 : i32
    %c0_i32_0 = arith.constant 0 : i32
    return %arg0, %c0_i32 : i32, i32
  }
}

module attributes {stable_mosaic.version = 11 : i64} {
  func.func @teacher_test_kernel(%arg0: i32, %arg1: i32, %arg2: memref<8x768xf32, #tpu.memory_space<vmem>>, %arg3: memref<768x128xbf16, #tpu.memory_space<vmem>>, %arg4: memref<128x128xbf16, #tpu.memory_space<vmem>>, %arg5: memref<8x128xf32, #tpu.memory_space<vmem>>, %arg6: memref<8x128xf32, #tpu.memory_space<vmem>>) attributes {dimension_semantics = [#tpu.dimension_semantics<parallel>, #tpu.dimension_semantics<arbitrary>], iteration_bounds = array<i64: 1, 1>, scalar_prefetch = 0 : i64, scratch_operands = 1 : i64, tpu.core_type = #tpu.core_type<tc>, window_params = [{transform_indices = @transform_0, window_bounds = array<i64: 8, 768>}, {transform_indices = @transform_1, window_bounds = array<i64: 768, 128>}, {pipeline_mode = #tpu.pipeline_mode<synchronous>, transform_indices = @transform_2, window_bounds = array<i64: 128, 128>}, {transform_indices = @transform_3, window_bounds = array<i64: 8, 128>}]} {
    %c0_i32 = arith.constant 0 : i32
    %0 = arith.cmpi eq, %arg1, %c0_i32 : i32
    %1 = arith.extui %0 : i1 to i32
    %c0_i32_0 = arith.constant 0 : i32
    %2 = arith.cmpi ne, %1, %c0_i32_0 : i32
    scf.if %2 {
      %cst_10 = arith.constant 0.000000e+00 : f32
      %13 = vector.broadcast %cst_10 : f32 to vector<8x128xf32>
      %c0_11 = arith.constant 0 : index
      %c0_12 = arith.constant 0 : index
      %14 = vector.load %arg6[%c0_11, %c0_12] : memref<8x128xf32, #tpu.memory_space<vmem>>, vector<8x128xf32>
      tpu.vector_store %arg6[%c0_11, %c0_12], %13 {strides = array<i32>} : memref<8x128xf32, #tpu.memory_space<vmem>>, vector<8x128xf32>,
    } else {
    }
    %c0 = arith.constant 0 : index
    %c0_1 = arith.constant 0 : index
    %3 = vector.load %arg2[%c0, %c0_1] : memref<8x768xf32, #tpu.memory_space<vmem>>, vector<8x768xf32>
    %4 = arith.truncf %3 : vector<8x768xf32> to vector<8x768xbf16>
    %c0_2 = arith.constant 0 : index
    %c0_3 = arith.constant 0 : index
    %5 = vector.load %arg6[%c0_2, %c0_3] : memref<8x128xf32, #tpu.memory_space<vmem>>, vector<8x128xf32>
    %c0_4 = arith.constant 0 : index
    %c0_5 = arith.constant 0 : index
    %6 = vector.load %arg3[%c0_4, %c0_5] : memref<768x128xbf16, #tpu.memory_space<vmem>>, vector<768x128xbf16>
    %cst = arith.constant dense<0.000000e+00> : vector<8x128xf32>
    %7 = tpu.matmul %4, %6, %cst {dimension_numbers = #tpu.dot_dimension_numbers<[1], [0], [0], [1], [0, 0, 1, 1], [], []>} : vector<8x768xbf16>, vector<768x128xbf16>, vector<8x128xf32> -> vector<8x128xf32>
    %8 = arith.addf %5, %7 : vector<8x128xf32>
    %c0_6 = arith.constant 0 : index
    %c0_7 = arith.constant 0 : index
    %9 = vector.load %arg6[%c0_6, %c0_7] : memref<8x128xf32, #tpu.memory_space<vmem>>, vector<8x128xf32>
    tpu.vector_store %arg6[%c0_6, %c0_7], %8 {strides = array<i32>} : memref<8x128xf32, #tpu.memory_space<vmem>>, vector<8x128xf32>,
    %c0_i32_8 = arith.constant 0 : i32
    %10 = arith.cmpi eq, %arg1, %c0_i32_8 : i32
    %11 = arith.extui %10 : i1 to i32
    %c0_i32_9 = arith.constant 0 : i32
    %12 = arith.cmpi ne, %11, %c0_i32_9 : i32
    scf.if %12 {
      %c0_10 = arith.constant 0 : index
      %c0_11 = arith.constant 0 : index
      %13 = vector.load %arg6[%c0_10, %c0_11] : memref<8x128xf32, #tpu.memory_space<vmem>>, vector<8x128xf32>
      %14 = arith.mulf %13, %13 : vector<8x128xf32>
      %cst_12 = arith.constant dense<0.000000e+00> : vector<8xf32>
      %15 = vector.multi_reduction <add>, %14, %cst_12 [1] : vector<8x128xf32> to vector<8xf32>
      %16 = vector.shape_cast %15 : vector<8xf32> to vector<8x1xf32>
      %cst_13 = arith.constant 1.000000e-30 : f32
      %17 = vector.broadcast %cst_13 : f32 to vector<8x1xf32>
      %18 = arith.maximumf %16, %17 : vector<8x1xf32>
      %19 = math.rsqrt %18 : vector<8x1xf32>
      %20 = vector.broadcast %19 : vector<8x1xf32> to vector<8x128xf32>
      %21 = arith.mulf %13, %20 : vector<8x128xf32>
      %22 = arith.truncf %21 : vector<8x128xf32> to vector<8x128xbf16>
      %c0_14 = arith.constant 0 : index
      %c0_15 = arith.constant 0 : index
      %23 = vector.load %arg4[%c0_14, %c0_15] : memref<128x128xbf16, #tpu.memory_space<vmem>>, vector<128x128xbf16>
      %cst_16 = arith.constant dense<0.000000e+00> : vector<8x128xf32>
      %24 = tpu.matmul %22, %23, %cst_16 {dimension_numbers = #tpu.dot_dimension_numbers<[1], [0], [0], [1], [0, 0, 1, 1], [], []>} : vector<8x128xbf16>, vector<128x128xbf16>, vector<8x128xf32> -> vector<8x128xf32>
      %c0_17 = arith.constant 0 : index
      %c0_18 = arith.constant 0 : index
      %25 = vector.load %arg5[%c0_17, %c0_18] : memref<8x128xf32, #tpu.memory_space<vmem>>, vector<8x128xf32>
      tpu.vector_store %arg5[%c0_17, %c0_18], %24 {strides = array<i32>} : memref<8x128xf32, #tpu.memory_space<vmem>>, vector<8x128xf32>,
    } else {
    }
    return
  }
  func.func @transform_0(%arg0: i32, %arg1: i32) -> (i32, i32) {
    %c0_i32 = arith.constant 0 : i32
    return %arg0, %arg1 : i32, i32
  }
  func.func @transform_1(%arg0: i32, %arg1: i32) -> (i32, i32) {
    %c0_i32 = arith.constant 0 : i32
    %c0_i32_0 = arith.constant 0 : i32
    return %arg1, %c0_i32 : i32, i32
  }
  func.func @transform_2(%arg0: i32, %arg1: i32) -> (i32, i32) {
    %c0_i32 = arith.constant 0 : i32
    %c0_i32_0 = arith.constant 0 : i32
    %c0_i32_1 = arith.constant 0 : i32
    return %c0_i32, %c0_i32_0 : i32, i32
  }
  func.func @transform_3(%arg0: i32, %arg1: i32) -> (i32, i32) {
    %c0_i32 = arith.constant 0 : i32
    %c0_i32_0 = arith.constant 0 : i32
    return %arg0, %c0_i32 : i32, i32
  }
}

</mosaic_0001>

<bundles_post_ra>
// kernel: tpu_custom_call.1
= control target key start
LH: loop header
LB: loop body
LE: loop exit
PB: predicated region body
PF: predicated region fallthrough
CT: control target
= control target key end

     0   :  { %8 = vsyncpa [#allocation4], 0  ;;  %s1104_s0 = inlined_call_operand.hbm [shape: f32[8,768], index: 0, kind: input, shape index: {}]   ;;  %s1105_s1 = inlined_call_operand.hbm [shape: bf16[768,128], index: 1, kind: input, shape index: {}]   ;;  %s1106_s2 = inlined_call_operand.hbm [shape: bf16[128,128], index: 2, kind: input, shape index: {}]   ;;  %s1107_s3 = inlined_call_operand.hbm [shape: f32[8,128], index: 3, kind: output, shape index: {}]  }
   0x1   :  { %9 = vsyncpa [#allocation7], 0 }
   0x2   :  { %10 = vsyncpa [#allocation5], 0  ;;  %s1022_s12 = smov [#allocation6]   ;;  %s928_s16 = scalar_lea.hbm %s1105_s1, 6144 }
   0x3   :  { %s26_s13 = sshll.u32 %s1022_s12, 4  ;;  %p929_p0 = scmp.ne.s32.totalorder %s1105_s1, %s928_s16  ;;  %s27_s13 = int_to_ptr.vmem [resolvable:$true] %s26_s13 }
   0x4   :  { %p932_p1 = scmp.lt.u32.totalorder %s928_s16, %s1105_s1 }
   0x6   :  { %p934_p2 = pnand %p932_p1, %p929_p0 }
   0x8   :  { %937 = shalt.err (!%p934_p2)
}
   0x9   :  { %s938_s21 = scalar_lea.vmem %s27_s13, 6144  ;;  %p943_p4 = scmp.lt.s32.totalorder %s27_s13, %s27_s13 }
   0xa   :  { %p939_p3 = scmp.ne.s32.totalorder %s27_s13, %s938_s21  ;;  %p944_p5 = scmp.lt.s32.totalorder %s938_s21, %s938_s21 }
   0xc   :  { %p945_p6 = por %p944_p5, %p943_p4 }
   0xe   :  { %p946_p7 = pnand %p945_p6, %p939_p3 }
  0x10   :  { %949 = shalt.err (!%p946_p7)
}
  0x11   :  { %s1023_s22 = smov 64   ;;  %s1024_s23 = smov 4  }
  0x12   :  { %32 = dma.hbm_to_vmem [thread:$0]  %s1105_s1, 6144, %s27_s13, [#allocation7], %s1023_s22, %s1023_s22, %s1024_s23  }
  0x13   :  { %s1025_s26 = smov [#allocation3]   ;;  %s1026_s28 = smov [#allocation8]  }
  0x14   :  { %s17_s27 = sshll.u32 %s1025_s26, 4  ;;  %s38_s29 = sshll.u32 %s1026_s28, 4  ;;  %s18_s27 = int_to_ptr.vmem [resolvable:$true] %s17_s27  ;;  %s39_s29 = int_to_ptr.vmem [resolvable:$true] %s38_s29 }
  0x15   :  { %s950_s5 = scalar_lea.hbm %s1104_s0, 768 }
  0x16   :  { %p951_p8 = scmp.ne.s32.totalorder %s1104_s0, %s950_s5  ;;  %p954_p9 = scmp.lt.u32.totalorder %s950_s5, %s1104_s0 }
  0x18   :  { %p956_p10 = pnand %p954_p9, %p951_p8 }
  0x1a   :  { %959 = shalt.err (!%p956_p10)
}
  0x1b   :  { %s960_s1 = scalar_lea.vmem %s18_s27, 768  ;;  %p965_p12 = scmp.lt.s32.totalorder %s18_s27, %s18_s27 }
  0x1c   :  { %p961_p11 = scmp.ne.s32.totalorder %s18_s27, %s960_s1  ;;  %p966_p13 = scmp.lt.s32.totalorder %s960_s1, %s960_s1 }
  0x1e   :  { %p967_p0 = por %p966_p13, %p965_p12 }
  0x20   :  { %p968_p1 = pnand %p967_p0, %p961_p11 }
  0x22   :  { %971 = shalt.err (!%p968_p1)
}
  0x23   :  { %20 = dma.hbm_to_vmem [thread:$0]  %s1104_s0, 768, %s18_s27, [#allocation4]  }
  0x24   :  { %s972_s14 = scalar_lea.hbm %s1106_s2, 1024 }
  0x25   :  { %p973_p2 = scmp.ne.s32.totalorder %s1106_s2, %s972_s14  ;;  %p976_p3 = scmp.lt.u32.totalorder %s972_s14, %s1106_s2 }
  0x27   :  { %p978_p4 = pnand %p976_p3, %p973_p2 }
  0x29   :  { %981 = shalt.err (!%p978_p4)
}
  0x2a   :  { %s982_s19 = scalar_lea.vmem %s39_s29, 1024  ;;  %p987_p6 = scmp.lt.s32.totalorder %s39_s29, %s39_s29 }
  0x2b   :  { %p983_p5 = scmp.ne.s32.totalorder %s39_s29, %s982_s19  ;;  %p988_p7 = scmp.lt.s32.totalorder %s982_s19, %s982_s19 }
  0x2d   :  { %p989_p8 = por %p988_p7, %p987_p6 }
  0x2f   :  { %p990_p9 = pnand %p989_p8, %p983_p5 }
  0x31   :  { %993 = shalt.err (!%p990_p9)
}
  0x32   :  { %44 = dma.hbm_to_vmem [thread:$0]  %s1106_s2, 1024, %s39_s29, [#allocation7], %s1023_s22, %s1023_s22, %s1024_s23  }
  0x33   :  { %1016 = dma.done.wait [#allocation4], 768  }
  0x34   :  { %1017 = vsyncadd [#allocation4], 4294966528 }
  0x35   :  { %1018 = dma.done.wait [#allocation7], 7168  }
  0x36   :  { %1019 = vsyncadd [#allocation7], 4294960128  ;;  %v870_v0 = vld [vmem:[#allocation6 + $0x40] sm:$0xff]   ;;  %v874_v4 = vld [vmem:[#allocation6 + $0x48] sm:$0xff]   ;;  %v1027_v61 = vmov 0.0   ;;  %vm1028_vm0 = vmmov 0  }
  0x37   :  { %v871_v1 = vld [vmem:[#allocation6 + $0xc0] sm:$0xff]   ;;  %767 = vmatprep.subr.bf16.mxu0 %v870_v0  ;;  %v875_v5 = vld [vmem:[#allocation6 + $0xc8] sm:$0xff]   ;;  %v878_v8 = vld [vmem:[#allocation6 + $0x50] sm:$0xff]   ;;  %s1029_s2 = smov [#allocation9]  }
  0x38   :  { %v872_v2 = vld [vmem:[#allocation6] sm:$0xff]   ;;  %789 = vmatprep.subr.bf16.mxu1 %v871_v1  ;;  %v876_v6 = vld [vmem:[#allocation6 + $0x8] sm:$0xff]   ;;  %v879_v9 = vld [vmem:[#allocation6 + $0xd0] sm:$0xff]   ;;  %s701_s21 = sshll.u32 %s1029_s2, 4  ;;  %s702_s21 = int_to_ptr.vmem [resolvable:$true] %s701_s21 }
  0x39   :  { %v873_v3 = vld [vmem:[#allocation6 + $0x80] sm:$0xff]   ;;  %768 = vmatpush3.bf16.msra.mxu0 %v872_v2  ;;  %v877_v7 = vld [vmem:[#allocation6 + $0x88] sm:$0xff]   ;;  %v880_v10 = vld [vmem:[#allocation6 + $0x10] sm:$0xff]   ;;  %s994_s22 = scalar_lea.vmem %s702_s21, 128  ;;  %p999_p11 = scmp.lt.s32.totalorder %s702_s21, %s702_s21 }
  0x3a   :  { %790 = vmatpush3.bf16.msra.mxu1 %v873_v3  ;;  %769 = vmatprep.subr.bf16.mxu0 %v874_v4  ;;  %v881_v11 = vld [vmem:[#allocation6 + $0x90] sm:$0xff]   ;;  %v882_v12 = vld [vmem:[#allocation6 + $0x58] sm:$0xff]   ;;  %v886_v16 = vld [vmem:[#allocation6 + $0x60] sm:$0xff]   ;;  %p995_p10 = scmp.ne.s32.totalorder %s702_s21, %s994_s22  ;;  %p1000_p12 = scmp.lt.s32.totalorder %s994_s22, %s994_s22 }
  0x3b   :  { %791 = vmatprep.subr.bf16.mxu1 %v875_v5  ;;  %v883_v13 = vld [vmem:[#allocation6 + $0xd8] sm:$0xff]   ;;  %v887_v17 = vld [vmem:[#allocation6 + $0xe0] sm:$0xff]   ;;  %v890_v20 = vld [vmem:[#allocation6 + $0x68] sm:$0xff]  }
  0x3c   :  { %v884_v14 = vld [vmem:[#allocation6 + $0x18] sm:$0xff]   ;;  %v888_v18 = vld [vmem:[#allocation6 + $0x20] sm:$0xff]   ;;  %v891_v21 = vld [vmem:[#allocation6 + $0xe8] sm:$0xff]   ;;  %p1001_p13 = por %p1000_p12, %p999_p11 }
  0x3d   :  { %770 = vmatpush3.bf16.msra.mxu0 %v876_v6  ;;  %v885_v15 = vld [vmem:[#allocation6 + $0x98] sm:$0xff]   ;;  %v889_v19 = vld [vmem:[#allocation6 + $0xa0] sm:$0xff]   ;;  %v892_v22 = vld [vmem:[#allocation6 + $0x28] sm:$0xff]  }
  0x3e   :  { %792 = vmatpush3.bf16.msra.mxu1 %v877_v7  ;;  %771 = vmatprep.subr.bf16.mxu0 %v878_v8  ;;  %v893_v23 = vld [vmem:[#allocation6 + $0xa8] sm:$0xff]   ;;  %v894_v24 = vld [vmem:[#allocation6 + $0x70] sm:$0xff]   ;;  %v898_v28 = vld [vmem:[#allocation6 + $0x78] sm:$0xff]   ;;  %p1002_p0 = pnand %p1001_p13, %p995_p10 }
  0x3f   :  { %793 = vmatprep.subr.bf16.mxu1 %v879_v9  ;;  %v895_v25 = vld [vmem:[#allocation6 + $0xf0] sm:$0xff]   ;;  %v899_v29 = vld [vmem:[#allocation6 + $0xf8] sm:$0xff]   ;;  %v63_v33 = vld [vmem:[#allocation3 + $0x18] sm:$0xff] }
  0x40   :  { %v896_v26 = vld [vmem:[#allocation6 + $0x30] sm:$0xff]   ;;  %v900_v30 = vld [vmem:[#allocation6 + $0x38] sm:$0xff]   ;;  %v69_v36 = vpack.c.bf16 %v63_v33, %v63_v33  ;;  %v62_v38 = vld [vmem:[#allocation3 + $0x10] sm:$0xff] }
  0x41   :  { %772 = vmatpush3.bf16.msra.mxu0 %v880_v10  ;;  %v897_v27 = vld [vmem:[#allocation6 + $0xb0] sm:$0xff]   ;;  %v901_v31 = vld [vmem:[#allocation6 + $0xb8] sm:$0xff]   ;;  %v68_v39 = vpack.c.bf16 %v62_v38, %v62_v38  ;;  %v902_v40 = vld [vmem:[#allocation6 + $0x140] sm:$0xff]  }
  0x42   :  { %794 = vmatpush3.bf16.msra.mxu1 %v881_v11  ;;  %773 = vmatprep.subr.bf16.mxu0 %v882_v12  ;;  %v61_v32 = vld [vmem:[#allocation3 + $0x8] sm:$0xff]  ;;  %v60_v34 = vld [vmem:[#allocation3] sm:$0xff]  ;;  %v903_v41 = vld [vmem:[#allocation6 + $0x100] sm:$0xff]  }
  0x43   :  { %795 = vmatprep.subr.bf16.mxu1 %v883_v13  ;;  %v67_v35 = vpack.c.bf16 %v61_v32, %v61_v32  ;;  %v66_v37 = vpack.c.bf16 %v60_v34, %v60_v34  ;;  %529 = vmatprep.mubr.bf16.mxu1 %v69_v36  ;;  %v904_v42 = vld [vmem:[#allocation6 + $0x148] sm:$0xff]   ;;  %v906_v44 = vld [vmem:[#allocation6 + $0x150] sm:$0xff]   ;;  %v908_v46 = vld [vmem:[#allocation6 + $0x158] sm:$0xff]  }
  0x44   :  { %v905_v43 = vld [vmem:[#allocation6 + $0x108] sm:$0xff]   ;;  %v907_v45 = vld [vmem:[#allocation6 + $0x110] sm:$0xff]   ;;  %v909_v47 = vld [vmem:[#allocation6 + $0x118] sm:$0xff]  }
  0x45   :  { %774 = vmatpush3.bf16.msra.mxu0 %v884_v14  ;;  %489 = vmatprep.mubr.bf16.mxu0 %v67_v35  ;;  %v910_v48 = vld [vmem:[#allocation6 + $0x160] sm:$0xff]   ;;  %v912_v50 = vld [vmem:[#allocation6 + $0x168] sm:$0xff]   ;;  %v65_v51 = vld [vmem:[#allocation3 + $0x28] sm:$0xff] }
  0x46   :  { %796 = vmatpush3.bf16.msra.mxu1 %v885_v15  ;;  %775 = vmatprep.subr.bf16.mxu0 %v886_v16  ;;  %v911_v49 = vld [vmem:[#allocation6 + $0x120] sm:$0xff]   ;;  %v71_v52 = vpack.c.bf16 %v65_v51, %v65_v51  ;;  %v913_v53 = vld [vmem:[#allocation6 + $0x128] sm:$0xff]   ;;  %v914_v54 = vld [vmem:[#allocation6 + $0x170] sm:$0xff]  }
  0x47   :  { %797 = vmatprep.subr.bf16.mxu1 %v887_v17  ;;  %v915_v55 = vld [vmem:[#allocation6 + $0x130] sm:$0xff]   ;;  %v916_v56 = vld [vmem:[#allocation6 + $0x178] sm:$0xff]   ;;  %v918_v60 = vld [vmem:[#allocation8] sm:$0xff]  }
  0x48   :  { %v917_v57 = vld [vmem:[#allocation6 + $0x138] sm:$0xff]   ;;  %v64_v58 = vld [vmem:[#allocation3 + $0x20] sm:$0xff]  ;;  %v919_v62 = vld [vmem:[#allocation8 + $0x8] sm:$0xff]  }
  0x49   :  { %776 = vmatpush3.bf16.msra.mxu0 %v888_v18  ;;  %v70_v59 = vpack.c.bf16 %v64_v58, %v64_v58  ;;  %v920_v63 = vld [vmem:[#allocation8 + $0x10] sm:$0xff]   ;;  %v921_v0 = vld [vmem:[#allocation8 + $0x18] sm:$0xff]  }
  0x4a   :  { %798 = vmatpush3.bf16.msra.mxu1 %v889_v19  ;;  %777 = vmatprep.subr.bf16.mxu0 %v890_v20  ;;  %v922_v19 = vld [vmem:[#allocation8 + $0x20] sm:$0xff]   ;;  %v923_v20 = vld [vmem:[#allocation8 + $0x28] sm:$0xff]  }
  0x4b   :  { %799 = vmatprep.subr.bf16.mxu1 %v891_v21  ;;  %v924_v21 = vld [vmem:[#allocation8 + $0x30] sm:$0xff]  }
  0x4d   :  { %778 = vmatpush3.bf16.msra.mxu0 %v892_v22  ;;  %v925_v22 = vld [vmem:[#allocation8 + $0x38] sm:$0xff]  }
  0x4e   :  { %800 = vmatpush3.bf16.msra.mxu1 %v893_v23  ;;  %779 = vmatprep.subr.bf16.mxu0 %v894_v24 }
  0x4f   :  { %801 = vmatprep.subr.bf16.mxu1 %v895_v25 }
  0x51   :  { %780 = vmatpush3.bf16.msra.mxu0 %v896_v26 }
  0x52   :  { %802 = vmatpush3.bf16.msra.mxu1 %v897_v27  ;;  %781 = vmatprep.subr.bf16.mxu0 %v898_v28 }
  0x53   :  { %803 = vmatprep.subr.bf16.mxu1 %v899_v29 }
  0x55   :  { %782 = vmatpush3.bf16.msra.mxu0 %v900_v30 }
  0x56   :  { %804 = vmatpush3.bf16.msra.mxu1 %v901_v31  ;;  %811 = vmatprep.subr.bf16.mxu0 %v902_v40 }
  0x57   :  { %842 = vmatprep.subr.bf16.mxu1 %v1027_v61 }
  0x58   :  { %490 = vmatmul.mubr.bf16.vlgmr.msra.gmra.mrb[0].mxu0 %v66_v37 }
  0x59   :  { %530 = vmatmul.mubr.bf16.vlgmr.msra.gmra.mrb[0].mxu1 %v68_v39  ;;  %812 = vmatpush3.bf16.msra.mxu0 %v903_v41 }
  0x5a   :  { %813 = vmatprep.subr.bf16.mxu0 %v904_v42  ;;  %569 = vmatprep.mubr.bf16.mxu0 %v71_v52 }
  0x5b   :  { %843 = vmatpush3.bf16.msra.mxu1 %v918_v60  ;;  %858 = vmatprep.mubr.msk.bf16.mxu1 %vm1028_vm0, %v1027_v61 }
  0x5c   :  { %844 = vmatprep.subr.bf16.mxu1 %v1027_v61 }
  0x5d   :  { %814 = vmatpush3.bf16.msra.mxu0 %v905_v43 }
  0x5e   :  { %815 = vmatprep.subr.bf16.mxu0 %v906_v44 }
  0x5f   :  { %845 = vmatpush3.bf16.msra.mxu1 %v919_v62 }
  0x60   :  { %846 = vmatprep.subr.bf16.mxu1 %v1027_v61 }
  0x61   :  { %816 = vmatpush3.bf16.msra.mxu0 %v907_v45 }
  0x62   :  { %817 = vmatprep.subr.bf16.mxu0 %v908_v46 }
  0x63   :  { %847 = vmatpush3.bf16.msra.mxu1 %v920_v63 }
  0x64   :  { %848 = vmatprep.subr.bf16.mxu1 %v1027_v61 }
  0x65   :  { %818 = vmatpush3.bf16.msra.mxu0 %v909_v47 }
  0x66   :  { %819 = vmatprep.subr.bf16.mxu0 %v910_v48 }
  0x67   :  { %849 = vmatpush3.bf16.msra.mxu1 %v921_v0 }
  0x68   :  { %850 = vmatprep.subr.bf16.mxu1 %v1027_v61 }
  0x69   :  { %820 = vmatpush3.bf16.msra.mxu0 %v911_v49 }
  0x6a   :  { %821 = vmatprep.subr.bf16.mxu0 %v912_v50 }
  0x6b   :  { %851 = vmatpush3.bf16.msra.mxu1 %v922_v19 }
  0x6c   :  { %852 = vmatprep.subr.bf16.mxu1 %v1027_v61 }
  0x6d   :  { %822 = vmatpush3.bf16.msra.mxu0 %v913_v53 }
  0x6e   :  { %823 = vmatprep.subr.bf16.mxu0 %v914_v54 }
  0x6f   :  { %853 = vmatpush3.bf16.msra.mxu1 %v923_v20 }
  0x70   :  { %854 = vmatprep.subr.bf16.mxu1 %v1027_v61 }
  0x71   :  { %824 = vmatpush3.bf16.msra.mxu0 %v915_v55 }
  0x72   :  { %825 = vmatprep.subr.bf16.mxu0 %v916_v56 }
  0x73   :  { %855 = vmatpush3.bf16.msra.mxu1 %v924_v21 }
  0x74   :  { %856 = vmatprep.subr.bf16.mxu1 %v1027_v61 }
  0x75   :  { %826 = vmatpush3.bf16.msra.mxu0 %v917_v57 }
  0x77   :  { %857 = vmatpush3.bf16.msra.mxu1 %v925_v22 }
  0x78   :  { %570 = vmatmul.mubr.bf16.vlgmr.msra.gmra.mrb[4].mxu0 %v70_v59 }
 0x12b   :  { %v783_v1 = vpop.f32.mrb[0].mxu0 }
 0x12c   :  { %v805_v2 = vpop.f32.mrb[0].mxu1  ;;  %v784_v3 = vpop.f32.mrb[1].mxu0 }
 0x12d   :  { %v806_v4 = vpop.f32.mrb[1].mxu1  ;;  %v785_v5 = vadd.f32 %v784_v3, %v783_v1  ;;  %v786_v7 = vpop.f32.mrb[2].mxu0 }
 0x12e   :  { %v807_v6 = vadd.f32 %v806_v4, %v805_v2  ;;  %v808_v8 = vpop.f32.mrb[2].mxu1  ;;  %v787_v9 = vpop.f32.mrb[3].mxu0 }
 0x12f   :  { %v809_v10 = vpop.f32.mrb[3].mxu1 }
 0x130   :  { %v532_v11 = vadd.f32 %v807_v6, %v785_v5 }
 0x14b   :  { %v827_v12 = vpop.f32.mrb[4].mxu0 }
 0x14c   :  { %v828_v13 = vpop.f32.mrb[5].mxu0 }
 0x14d   :  { %v829_v14 = vadd.f32 %v828_v13, %v827_v12  ;;  %v830_v15 = vpop.f32.mrb[6].mxu0 }
 0x14e   :  { %v831_v16 = vpop.f32.mrb[7].mxu0 }
 0x14f   :  { %v572_v17 = vadd.f32 %v829_v14, %v532_v11 }
 0x151   :  { %v583_v18 = vmul.f32 %v572_v17, %v572_v17 }
 0x153   :  { %584 = vadd.xlane.f32.xlu0 %v583_v18 }
 0x1e0   :  { %v585_v23 = vpop.xlane.xlu0 %584 }
 0x1e1   :  { %v586_v24 = vmax.f32 %v585_v23, 1e-30 }
 0x1e3   :  { %926 = vrsqrt.f32 %v586_v24 }
 0x1ed   :  { %v927_v25 = vpop.eup %926 }
 0x1ee   :  { %v588_v26 = vmul.f32 %v927_v25, %v572_v17 }
 0x1f0   :  { %v589_v27 = vpack.c.bf16 %v588_v26, %v588_v26 }
 0x1f2   :  { %859 = vmatmul.mubr.bf16.vlgmr.msra.gmra.mrb[4].mxu1 %v589_v27 }
 0x2c5   :  { %v688_v28 = vpop.f32.mrb[4].mxu1 }
 0x2c6   :  { %694 = vst [vmem:[#allocation9] sm:$0xff] %v688_v28  ;;  %v860_v29 = vpop.f32.mrb[5].mxu1 }
 0x2c7   :  { %v691_v30 = vpop.f32.mrb[6].mxu1 }
 0x2c8   :  { %1005 = shalt.err (!%p1002_p0)
}
 0x2c9   :  { %s1006_s25 = scalar_lea.hbm %s1107_s3, 128 }
 0x2ca   :  { %p1007_p1 = scmp.ne.s32.totalorder %s1107_s3, %s1006_s25  ;;  %p1010_p2 = scmp.lt.u32.totalorder %s1006_s25, %s1107_s3 }
 0x2cc   :  { %p1012_p3 = pnand %p1010_p2, %p1007_p1 }
 0x2ce   :  { %1015 = shalt.err (!%p1012_p3)
}
 0x2cf   :  { %704 = dma.vmem_to_hbm [thread:$0]  %s702_s21, 128, %s1107_s3, [#allocation5]   ;;  %v861_v31 = vpop.f32.mrb[7].mxu1 }
 0x2d0   :  { %1020 = dma.done.wait [#allocation5], 128  }
 0x2d1   :  { %1021 = vsyncadd [#allocation5], 4294967168 }
 0x2d2   :  { %708 = vsyncpa [#allocation4], 1 }
 0x2d3   :  { %709 = vsyncpa [#allocation7], 1 }
 0x2d4   :  { %710 = vsyncpa [#allocation5], 1 }

// kernel: tpu_custom_call.1
= control target key start
LH: loop header
LB: loop body
LE: loop exit
PB: predicated region body
PF: predicated region fallthrough
CT: control target
= control target key end

     0   :  { %8 = vsyncpa [#allocation4], 0  ;;  %s1104_s0 = inlined_call_operand.hbm [shape: f32[8,768], index: 0, kind: input, shape index: {}]   ;;  %s1105_s1 = inlined_call_operand.hbm [shape: bf16[768,128], index: 1, kind: input, shape index: {}]   ;;  %s1106_s2 = inlined_call_operand.hbm [shape: bf16[128,128], index: 2, kind: input, shape index: {}]   ;;  %s1107_s3 = inlined_call_operand.hbm [shape: f32[8,128], index: 3, kind: output, shape index: {}]  }
   0x1   :  { %9 = vsyncpa [#allocation7], 0 }
   0x2   :  { %10 = vsyncpa [#allocation5], 0  ;;  %s1022_s12 = smov [#allocation6]   ;;  %s928_s16 = scalar_lea.hbm %s1105_s1, 6144 }
   0x3   :  { %s26_s13 = sshll.u32 %s1022_s12, 4  ;;  %p929_p0 = scmp.ne.s32.totalorder %s1105_s1, %s928_s16  ;;  %s27_s13 = int_to_ptr.vmem [resolvable:$true] %s26_s13 }
   0x4   :  { %p932_p1 = scmp.lt.u32.totalorder %s928_s16, %s1105_s1 }
   0x6   :  { %p934_p2 = pnand %p932_p1, %p929_p0 }
   0x8   :  { %937 = shalt.err (!%p934_p2)
}
   0x9   :  { %s938_s21 = scalar_lea.vmem %s27_s13, 6144  ;;  %p943_p4 = scmp.lt.s32.totalorder %s27_s13, %s27_s13 }
   0xa   :  { %p939_p3 = scmp.ne.s32.totalorder %s27_s13, %s938_s21  ;;  %p944_p5 = scmp.lt.s32.totalorder %s938_s21, %s938_s21 }
   0xc   :  { %p945_p6 = por %p944_p5, %p943_p4 }
   0xe   :  { %p946_p7 = pnand %p945_p6, %p939_p3 }
  0x10   :  { %949 = shalt.err (!%p946_p7)
}
  0x11   :  { %s1023_s22 = smov 64   ;;  %s1024_s23 = smov 4  }
  0x12   :  { %32 = dma.hbm_to_vmem [thread:$0]  %s1105_s1, 6144, %s27_s13, [#allocation7], %s1023_s22, %s1023_s22, %s1024_s23  }
  0x13   :  { %s1025_s26 = smov [#allocation3]   ;;  %s1026_s28 = smov [#allocation8]  }
  0x14   :  { %s17_s27 = sshll.u32 %s1025_s26, 4  ;;  %s38_s29 = sshll.u32 %s1026_s28, 4  ;;  %s18_s27 = int_to_ptr.vmem [resolvable:$true] %s17_s27  ;;  %s39_s29 = int_to_ptr.vmem [resolvable:$true] %s38_s29 }
  0x15   :  { %s950_s5 = scalar_lea.hbm %s1104_s0, 768 }
  0x16   :  { %p951_p8 = scmp.ne.s32.totalorder %s1104_s0, %s950_s5  ;;  %p954_p9 = scmp.lt.u32.totalorder %s950_s5, %s1104_s0 }
  0x18   :  { %p956_p10 = pnand %p954_p9, %p951_p8 }
  0x1a   :  { %959 = shalt.err (!%p956_p10)
}
  0x1b   :  { %s960_s1 = scalar_lea.vmem %s18_s27, 768  ;;  %p965_p12 = scmp.lt.s32.totalorder %s18_s27, %s18_s27 }
  0x1c   :  { %p961_p11 = scmp.ne.s32.totalorder %s18_s27, %s960_s1  ;;  %p966_p13 = scmp.lt.s32.totalorder %s960_s1, %s960_s1 }
  0x1e   :  { %p967_p0 = por %p966_p13, %p965_p12 }
  0x20   :  { %p968_p1 = pnand %p967_p0, %p961_p11 }
  0x22   :  { %971 = shalt.err (!%p968_p1)
}
  0x23   :  { %20 = dma.hbm_to_vmem [thread:$0]  %s1104_s0, 768, %s18_s27, [#allocation4]  }
  0x24   :  { %s972_s14 = scalar_lea.hbm %s1106_s2, 1024 }
  0x25   :  { %p973_p2 = scmp.ne.s32.totalorder %s1106_s2, %s972_s14  ;;  %p976_p3 = scmp.lt.u32.totalorder %s972_s14, %s1106_s2 }
  0x27   :  { %p978_p4 = pnand %p976_p3, %p973_p2 }
  0x29   :  { %981 = shalt.err (!%p978_p4)
}
  0x2a   :  { %s982_s19 = scalar_lea.vmem %s39_s29, 1024  ;;  %p987_p6 = scmp.lt.s32.totalorder %s39_s29, %s39_s29 }
  0x2b   :  { %p983_p5 = scmp.ne.s32.totalorder %s39_s29, %s982_s19  ;;  %p988_p7 = scmp.lt.s32.totalorder %s982_s19, %s982_s19 }
  0x2d   :  { %p989_p8 = por %p988_p7, %p987_p6 }
  0x2f   :  { %p990_p9 = pnand %p989_p8, %p983_p5 }
  0x31   :  { %993 = shalt.err (!%p990_p9)
}
  0x32   :  { %44 = dma.hbm_to_vmem [thread:$0]  %s1106_s2, 1024, %s39_s29, [#allocation7], %s1023_s22, %s1023_s22, %s1024_s23  }
  0x33   :  { %1016 = dma.done.wait [#allocation4], 768  }
  0x34   :  { %1017 = vsyncadd [#allocation4], 4294966528 }
  0x35   :  { %1018 = dma.done.wait [#allocation7], 7168  }
  0x36   :  { %1019 = vsyncadd [#allocation7], 4294960128  ;;  %v870_v0 = vld [vmem:[#allocation6 + $0x40] sm:$0xff]   ;;  %v874_v4 = vld [vmem:[#allocation6 + $0x48] sm:$0xff]   ;;  %v1027_v61 = vmov 0.0   ;;  %vm1028_vm0 = vmmov 0  }
  0x37   :  { %v871_v1 = vld [vmem:[#allocation6 + $0xc0] sm:$0xff]   ;;  %767 = vmatprep.subr.bf16.mxu0 %v870_v0  ;;  %v875_v5 = vld [vmem:[#allocation6 + $0xc8] sm:$0xff]   ;;  %v878_v8 = vld [vmem:[#allocation6 + $0x50] sm:$0xff]   ;;  %s1029_s2 = smov [#allocation9]  }
  0x38   :  { %v872_v2 = vld [vmem:[#allocation6] sm:$0xff]   ;;  %789 = vmatprep.subr.bf16.mxu1 %v871_v1  ;;  %v876_v6 = vld [vmem:[#allocation6 + $0x8] sm:$0xff]   ;;  %v879_v9 = vld [vmem:[#allocation6 + $0xd0] sm:$0xff]   ;;  %s701_s21 = sshll.u32 %s1029_s2, 4  ;;  %s702_s21 = int_to_ptr.vmem [resolvable:$true] %s701_s21 }
  0x39   :  { %v873_v3 = vld [vmem:[#allocation6 + $0x80] sm:$0xff]   ;;  %768 = vmatpush3.bf16.msra.mxu0 %v872_v2  ;;  %v877_v7 = vld [vmem:[#allocation6 + $0x88] sm:$0xff]   ;;  %v880_v10 = vld [vmem:[#allocation6 + $0x10] sm:$0xff]   ;;  %s994_s22 = scalar_lea.vmem %s702_s21, 128  ;;  %p999_p11 = scmp.lt.s32.totalorder %s702_s21, %s702_s21 }
  0x3a   :  { %790 = vmatpush3.bf16.msra.mxu1 %v873_v3  ;;  %769 = vmatprep.subr.bf16.mxu0 %v874_v4  ;;  %v881_v11 = vld [vmem:[#allocation6 + $0x90] sm:$0xff]   ;;  %v882_v12 = vld [vmem:[#allocation6 + $0x58] sm:$0xff]   ;;  %v886_v16 = vld [vmem:[#allocation6 + $0x60] sm:$0xff]   ;;  %p995_p10 = scmp.ne.s32.totalorder %s702_s21, %s994_s22  ;;  %p1000_p12 = scmp.lt.s32.totalorder %s994_s22, %s994_s22 }
  0x3b   :  { %791 = vmatprep.subr.bf16.mxu1 %v875_v5  ;;  %v883_v13 = vld [vmem:[#allocation6 + $0xd8] sm:$0xff]   ;;  %v887_v17 = vld [vmem:[#allocation6 + $0xe0] sm:$0xff]   ;;  %v890_v20 = vld [vmem:[#allocation6 + $0x68] sm:$0xff]  }
  0x3c   :  { %v884_v14 = vld [vmem:[#allocation6 + $0x18] sm:$0xff]   ;;  %v888_v18 = vld [vmem:[#allocation6 + $0x20] sm:$0xff]   ;;  %v891_v21 = vld [vmem:[#allocation6 + $0xe8] sm:$0xff]   ;;  %p1001_p13 = por %p1000_p12, %p999_p11 }
  0x3d   :  { %770 = vmatpush3.bf16.msra.mxu0 %v876_v6  ;;  %v885_v15 = vld [vmem:[#allocation6 + $0x98] sm:$0xff]   ;;  %v889_v19 = vld [vmem:[#allocation6 + $0xa0] sm:$0xff]   ;;  %v892_v22 = vld [vmem:[#allocation6 + $0x28] sm:$0xff]  }
  0x3e   :  { %792 = vmatpush3.bf16.msra.mxu1 %v877_v7  ;;  %771 = vmatprep.subr.bf16.mxu0 %v878_v8  ;;  %v893_v23 = vld [vmem:[#allocation6 + $0xa8] sm:$0xff]   ;;  %v894_v24 = vld [vmem:[#allocation6 + $0x70] sm:$0xff]   ;;  %v898_v28 = vld [vmem:[#allocation6 + $0x78] sm:$0xff]   ;;  %p1002_p0 = pnand %p1001_p13, %p995_p10 }
  0x3f   :  { %793 = vmatprep.subr.bf16.mxu1 %v879_v9  ;;  %v895_v25 = vld [vmem:[#allocation6 + $0xf0] sm:$0xff]   ;;  %v899_v29 = vld [vmem:[#allocation6 + $0xf8] sm:$0xff]   ;;  %v63_v33 = vld [vmem:[#allocation3 + $0x18] sm:$0xff] }
  0x40   :  { %v896_v26 = vld [vmem:[#allocation6 + $0x30] sm:$0xff]   ;;  %v900_v30 = vld [vmem:[#allocation6 + $0x38] sm:$0xff]   ;;  %v69_v36 = vpack.c.bf16 %v63_v33, %v63_v33  ;;  %v62_v38 = vld [vmem:[#allocation3 + $0x10] sm:$0xff] }
  0x41   :  { %772 = vmatpush3.bf16.msra.mxu0 %v880_v10  ;;  %v897_v27 = vld [vmem:[#allocation6 + $0xb0] sm:$0xff]   ;;  %v901_v31 = vld [vmem:[#allocation6 + $0xb8] sm:$0xff]   ;;  %v68_v39 = vpack.c.bf16 %v62_v38, %v62_v38  ;;  %v902_v40 = vld [vmem:[#allocation6 + $0x140] sm:$0xff]  }
  0x42   :  { %794 = vmatpush3.bf16.msra.mxu1 %v881_v11  ;;  %773 = vmatprep.subr.bf16.mxu0 %v882_v12  ;;  %v61_v32 = vld [vmem:[#allocation3 + $0x8] sm:$0xff]  ;;  %v60_v34 = vld [vmem:[#allocation3] sm:$0xff]  ;;  %v903_v41 = vld [vmem:[#allocation6 + $0x100] sm:$0xff]  }
  0x43   :  { %795 = vmatprep.subr.bf16.mxu1 %v883_v13  ;;  %v67_v35 = vpack.c.bf16 %v61_v32, %v61_v32  ;;  %v66_v37 = vpack.c.bf16 %v60_v34, %v60_v34  ;;  %529 = vmatprep.mubr.bf16.mxu1 %v69_v36  ;;  %v904_v42 = vld [vmem:[#allocation6 + $0x148] sm:$0xff]   ;;  %v906_v44 = vld [vmem:[#allocation6 + $0x150] sm:$0xff]   ;;  %v908_v46 = vld [vmem:[#allocation6 + $0x158] sm:$0xff]  }
  0x44   :  { %v905_v43 = vld [vmem:[#allocation6 + $0x108] sm:$0xff]   ;;  %v907_v45 = vld [vmem:[#allocation6 + $0x110] sm:$0xff]   ;;  %v909_v47 = vld [vmem:[#allocation6 + $0x118] sm:$0xff]  }
  0x45   :  { %774 = vmatpush3.bf16.msra.mxu0 %v884_v14  ;;  %489 = vmatprep.mubr.bf16.mxu0 %v67_v35  ;;  %v910_v48 = vld [vmem:[#allocation6 + $0x160] sm:$0xff]   ;;  %v912_v50 = vld [vmem:[#allocation6 + $0x168] sm:$0xff]   ;;  %v65_v51 = vld [vmem:[#allocation3 + $0x28] sm:$0xff] }
  0x46   :  { %796 = vmatpush3.bf16.msra.mxu1 %v885_v15  ;;  %775 = vmatprep.subr.bf16.mxu0 %v886_v16  ;;  %v911_v49 = vld [vmem:[#allocation6 + $0x120] sm:$0xff]   ;;  %v71_v52 = vpack.c.bf16 %v65_v51, %v65_v51  ;;  %v913_v53 = vld [vmem:[#allocation6 + $0x128] sm:$0xff]   ;;  %v914_v54 = vld [vmem:[#allocation6 + $0x170] sm:$0xff]  }
  0x47   :  { %797 = vmatprep.subr.bf16.mxu1 %v887_v17  ;;  %v915_v55 = vld [vmem:[#allocation6 + $0x130] sm:$0xff]   ;;  %v916_v56 = vld [vmem:[#allocation6 + $0x178] sm:$0xff]   ;;  %v918_v60 = vld [vmem:[#allocation8] sm:$0xff]  }
  0x48   :  { %v917_v57 = vld [vmem:[#allocation6 + $0x138] sm:$0xff]   ;;  %v64_v58 = vld [vmem:[#allocation3 + $0x20] sm:$0xff]  ;;  %v919_v62 = vld [vmem:[#allocation8 + $0x8] sm:$0xff]  }
  0x49   :  { %776 = vmatpush3.bf16.msra.mxu0 %v888_v18  ;;  %v70_v59 = vpack.c.bf16 %v64_v58, %v64_v58  ;;  %v920_v63 = vld [vmem:[#allocation8 + $0x10] sm:$0xff]   ;;  %v921_v0 = vld [vmem:[#allocation8 + $0x18] sm:$0xff]  }
  0x4a   :  { %798 = vmatpush3.bf16.msra.mxu1 %v889_v19  ;;  %777 = vmatprep.subr.bf16.mxu0 %v890_v20  ;;  %v922_v19 = vld [vmem:[#allocation8 + $0x20] sm:$0xff]   ;;  %v923_v20 = vld [vmem:[#allocation8 + $0x28] sm:$0xff]  }
  0x4b   :  { %799 = vmatprep.subr.bf16.mxu1 %v891_v21  ;;  %v924_v21 = vld [vmem:[#allocation8 + $0x30] sm:$0xff]  }
  0x4d   :  { %778 = vmatpush3.bf16.msra.mxu0 %v892_v22  ;;  %v925_v22 = vld [vmem:[#allocation8 + $0x38] sm:$0xff]  }
  0x4e   :  { %800 = vmatpush3.bf16.msra.mxu1 %v893_v23  ;;  %779 = vmatprep.subr.bf16.mxu0 %v894_v24 }
  0x4f   :  { %801 = vmatprep.subr.bf16.mxu1 %v895_v25 }
  0x51   :  { %780 = vmatpush3.bf16.msra.mxu0 %v896_v26 }
  0x52   :  { %802 = vmatpush3.bf16.msra.mxu1 %v897_v27  ;;  %781 = vmatprep.subr.bf16.mxu0 %v898_v28 }
  0x53   :  { %803 = vmatprep.subr.bf16.mxu1 %v899_v29 }
  0x55   :  { %782 = vmatpush3.bf16.msra.mxu0 %v900_v30 }
  0x56   :  { %804 = vmatpush3.bf16.msra.mxu1 %v901_v31  ;;  %811 = vmatprep.subr.bf16.mxu0 %v902_v40 }
  0x57   :  { %842 = vmatprep.subr.bf16.mxu1 %v1027_v61 }
  0x58   :  { %490 = vmatmul.mubr.bf16.vlgmr.msra.gmra.mrb[0].mxu0 %v66_v37 }
  0x59   :  { %530 = vmatmul.mubr.bf16.vlgmr.msra.gmra.mrb[0].mxu1 %v68_v39  ;;  %812 = vmatpush3.bf16.msra.mxu0 %v903_v41 }
  0x5a   :  { %813 = vmatprep.subr.bf16.mxu0 %v904_v42  ;;  %569 = vmatprep.mubr.bf16.mxu0 %v71_v52 }
  0x5b   :  { %843 = vmatpush3.bf16.msra.mxu1 %v918_v60  ;;  %858 = vmatprep.mubr.msk.bf16.mxu1 %vm1028_vm0, %v1027_v61 }
  0x5c   :  { %844 = vmatprep.subr.bf16.mxu1 %v1027_v61 }
  0x5d   :  { %814 = vmatpush3.bf16.msra.mxu0 %v905_v43 }
  0x5e   :  { %815 = vmatprep.subr.bf16.mxu0 %v906_v44 }
  0x5f   :  { %845 = vmatpush3.bf16.msra.mxu1 %v919_v62 }
  0x60   :  { %846 = vmatprep.subr.bf16.mxu1 %v1027_v61 }
  0x61   :  { %816 = vmatpush3.bf16.msra.mxu0 %v907_v45 }
  0x62   :  { %817 = vmatprep.subr.bf16.mxu0 %v908_v46 }
  0x63   :  { %847 = vmatpush3.bf16.msra.mxu1 %v920_v63 }
  0x64   :  { %848 = vmatprep.subr.bf16.mxu1 %v1027_v61 }
  0x65   :  { %818 = vmatpush3.bf16.msra.mxu0 %v909_v47 }
  0x66   :  { %819 = vmatprep.subr.bf16.mxu0 %v910_v48 }
  0x67   :  { %849 = vmatpush3.bf16.msra.mxu1 %v921_v0 }
  0x68   :  { %850 = vmatprep.subr.bf16.mxu1 %v1027_v61 }
  0x69   :  { %820 = vmatpush3.bf16.msra.mxu0 %v911_v49 }
  0x6a   :  { %821 = vmatprep.subr.bf16.mxu0 %v912_v50 }
  0x6b   :  { %851 = vmatpush3.bf16.msra.mxu1 %v922_v19 }
  0x6c   :  { %852 = vmatprep.subr.bf16.mxu1 %v1027_v61 }
  0x6d   :  { %822 = vmatpush3.bf16.msra.mxu0 %v913_v53 }
  0x6e   :  { %823 = vmatprep.subr.bf16.mxu0 %v914_v54 }
  0x6f   :  { %853 = vmatpush3.bf16.msra.mxu1 %v923_v20 }
  0x70   :  { %854 = vmatprep.subr.bf16.mxu1 %v1027_v61 }
  0x71   :  { %824 = vmatpush3.bf16.msra.mxu0 %v915_v55 }
  0x72   :  { %825 = vmatprep.subr.bf16.mxu0 %v916_v56 }
  0x73   :  { %855 = vmatpush3.bf16.msra.mxu1 %v924_v21 }
  0x74   :  { %856 = vmatprep.subr.bf16.mxu1 %v1027_v61 }
  0x75   :  { %826 = vmatpush3.bf16.msra.mxu0 %v917_v57 }
  0x77   :  { %857 = vmatpush3.bf16.msra.mxu1 %v925_v22 }
  0x78   :  { %570 = vmatmul.mubr.bf16.vlgmr.msra.gmra.mrb[4].mxu0 %v70_v59 }
 0x12b   :  { %v783_v1 = vpop.f32.mrb[0].mxu0 }
 0x12c   :  { %v805_v2 = vpop.f32.mrb[0].mxu1  ;;  %v784_v3 = vpop.f32.mrb[1].mxu0 }
 0x12d   :  { %v806_v4 = vpop.f32.mrb[1].mxu1  ;;  %v785_v5 = vadd.f32 %v784_v3, %v783_v1  ;;  %v786_v7 = vpop.f32.mrb[2].mxu0 }
 0x12e   :  { %v807_v6 = vadd.f32 %v806_v4, %v805_v2  ;;  %v808_v8 = vpop.f32.mrb[2].mxu1  ;;  %v787_v9 = vpop.f32.mrb[3].mxu0 }
 0x12f   :  { %v809_v10 = vpop.f32.mrb[3].mxu1 }
 0x130   :  { %v532_v11 = vadd.f32 %v807_v6, %v785_v5 }
 0x14b   :  { %v827_v12 = vpop.f32.mrb[4].mxu0 }
 0x14c   :  { %v828_v13 = vpop.f32.mrb[5].mxu0 }
 0x14d   :  { %v829_v14 = vadd.f32 %v828_v13, %v827_v12  ;;  %v830_v15 = vpop.f32.mrb[6].mxu0 }
 0x14e   :  { %v831_v16 = vpop.f32.mrb[7].mxu0 }
 0x14f   :  { %v572_v17 = vadd.f32 %v829_v14, %v532_v11 }
 0x151   :  { %v583_v18 = vmul.f32 %v572_v17, %v572_v17 }
 0x153   :  { %584 = vadd.xlane.f32.xlu0 %v583_v18 }
 0x1e0   :  { %v585_v23 = vpop.xlane.xlu0 %584 }
 0x1e1   :  { %v586_v24 = vmax.f32 %v585_v23, 1e-30 }
 0x1e3   :  { %926 = vrsqrt.f32 %v586_v24 }
 0x1ed   :  { %v927_v25 = vpop.eup %926 }
 0x1ee   :  { %v588_v26 = vmul.f32 %v927_v25, %v572_v17 }
 0x1f0   :  { %v589_v27 = vpack.c.bf16 %v588_v26, %v588_v26 }
 0x1f2   :  { %859 = vmatmul.mubr.bf16.vlgmr.msra.gmra.mrb[4].mxu1 %v589_v27 }
 0x2c5   :  { %v688_v28 = vpop.f32.mrb[4].mxu1 }
 0x2c6   :  { %694 = vst [vmem:[#allocation9] sm:$0xff] %v688_v28  ;;  %v860_v29 = vpop.f32.mrb[5].mxu1 }
 0x2c7   :  { %v691_v30 = vpop.f32.mrb[6].mxu1 }
 0x2c8   :  { %1005 = shalt.err (!%p1002_p0)
}
 0x2c9   :  { %s1006_s25 = scalar_lea.hbm %s1107_s3, 128 }
 0x2ca   :  { %p1007_p1 = scmp.ne.s32.totalorder %s1107_s3, %s1006_s25  ;;  %p1010_p2 = scmp.lt.u32.totalorder %s1006_s25, %s1107_s3 }
 0x2cc   :  { %p1012_p3 = pnand %p1010_p2, %p1007_p1 }
 0x2ce   :  { %1015 = shalt.err (!%p1012_p3)
}
 0x2cf   :  { %704 = dma.vmem_to_hbm [thread:$0]  %s702_s21, 128, %s1107_s3, [#allocation5]   ;;  %v861_v31 = vpop.f32.mrb[7].mxu1 }
 0x2d0   :  { %1020 = dma.done.wait [#allocation5], 128  }
 0x2d1   :  { %1021 = vsyncadd [#allocation5], 4294967168 }
 0x2d2   :  { %708 = vsyncpa [#allocation4], 1 }
 0x2d3   :  { %709 = vsyncpa [#allocation7], 1 }
 0x2d4   :  { %710 = vsyncpa [#allocation5], 1 }

</bundles_post_ra>
